<compile_context>
chip_gen: v7x
topology: tpu7x:2x2x1
jax: 0.10.0
libtpu: 0.0.40
codegen_flags: <defaults>
</compile_context>

<pallas_src>
import functools
import math

import jax
import jax.numpy as jnp
from jax.experimental import pallas as pl
from jax.experimental.pallas import tpu as pltpu


# --------------------------- hardware-aware config -------------------------- #

@functools.lru_cache(maxsize=None)
def _vmem_capacity_bytes():
    try:
        return int(pltpu.get_tpu_info().vmem_capacity_bytes)
    except Exception:
        return 64 * 1024 * 1024  # conservative (v7x-sized) fallback


def _vmem_limit_bytes():
    # Leave headroom for Mosaic internal scratch / double buffering.
    return min(int(_vmem_capacity_bytes() * 0.55), 96 * 1024 * 1024)


def _mm_tile_targets():
    """(row, col, contraction) tile targets for the tiled matmuls."""
    if _vmem_capacity_bytes() >= (100 << 20):   # v5e / v6e: 128 MiB VMEM
        return 512, 1024, 1024
    return 256, 512, 512                        # v7x: 64 MiB VMEM / unknown


# ------------------------------ tiling helpers ------------------------------ #

def _round_up(x, m):
    return (x + m - 1) // m * m


def _row_tile(m, target):
    """Row (sublane) tile: the full M if it fits in one block, otherwise an
    8-aligned tile; pl.cdiv grids + Pallas boundary masking handle the tail, so
    M never collapses to tiny divisor-constrained tiles."""
    t = max(8, (target // 8) * 8)
    return m if m <= t else t


def _col_tile(dim, target, align=128):
    """Largest divisor of `dim` <= target that is a multiple of `align`; falls
    back to the full dim (always a legal block) for small / unaligned dims
    (real FLAVA weight dims are all multiples of 128)."""
    if dim % align != 0 or dim <= align:
        return dim
    t = min(target - target % align, dim - dim % align)
    while t >= align:
        if dim % t == 0:
            return t
        t -= align
    return dim


# ----------------------------- Pallas kernels ------------------------------ #

def _layernorm_kernel(x_ref, g_ref, b_ref, o_ref, *, eps):
    x = x_ref[...].astype(jnp.float32)
    mean = jnp.mean(x, axis=-1, keepdims=True)
    var = jnp.mean(jnp.square(x - mean), axis=-1, keepdims=True)
    y = (x - mean) * jax.lax.rsqrt(var + eps) * g_ref[...].astype(jnp.float32) \
        + b_ref[...].astype(jnp.float32)
    o_ref[...] = y.astype(o_ref.dtype)


def layernorm(x, gamma, beta, eps=1e-12):
    """Row-tiled LayerNorm over the last axis."""
    lead = x.shape[:-1]
    H = x.shape[-1]
    x2 = x.reshape(-1, H)
    M = x2.shape[0]
    btm = _row_tile(M, 512)
    out = pl.pallas_call(
        functools.partial(_layernorm_kernel, eps=eps),
        grid=(pl.cdiv(M, btm),),
        in_specs=[
            pl.BlockSpec((btm, H), lambda i: (i, 0)),
            pl.BlockSpec((1, H), lambda i: (0, 0)),
            pl.BlockSpec((1, H), lambda i: (0, 0)),
        ],
        out_specs=pl.BlockSpec((btm, H), lambda i: (i, 0)),
        out_shape=jax.ShapeDtypeStruct((M, H), x.dtype),
        compiler_params=pltpu.CompilerParams(
            dimension_semantics=("parallel",),
            vmem_limit_bytes=_vmem_limit_bytes()),
    )(x2, gamma.reshape(1, H), beta.reshape(1, H))
    return out.reshape(*lead, H)


def _linear_kernel(x_ref, w_ref, b_ref, *rest, activation, has_residual):
    if has_residual:
        res_ref, o_ref, acc_ref = rest
    else:
        o_ref, acc_ref = rest
    k = pl.program_id(2)

    @pl.when(k == 0)
    def _():
        acc_ref[...] = jnp.zeros_like(acc_ref)

    acc_ref[...] += jnp.dot(x_ref[...], w_ref[...],
                            preferred_element_type=jnp.float32)

    @pl.when(k == pl.num_programs(2) - 1)
    def _():
        y = acc_ref[...] + b_ref[...].astype(jnp.float32)
        if activation == "gelu":
            y = jax.nn.gelu(y, approximate=False)   # exact erf GELU (nn.GELU default)
        elif activation == "tanh":
            y = jnp.tanh(y)
        if has_residual:
            y = y + res_ref[...].astype(jnp.float32)   # fused residual add
        o_ref[...] = y.astype(o_ref.dtype)


def linear(x, w, b, residual=None, activation="none"):
    """Tiled, pipelined matmul: x (..., K) @ w (K, N) + b, with optional
    activation and residual add fused into the last-k epilogue."""
    lead = x.shape[:-1]
    K = x.shape[-1]
    N = w.shape[1]
    x2 = x.reshape(-1, K)
    M = x2.shape[0]
    tm_t, tn_t, tk_t = _mm_tile_targets()
    btm = _row_tile(M, tm_t)
    btn = _col_tile(N, tn_t)
    btk = _col_tile(K, tk_t)

    in_specs = [
        pl.BlockSpec((btm, btk), lambda i, j, k: (i, k)),
        pl.BlockSpec((btk, btn), lambda i, j, k: (k, j)),
        pl.BlockSpec((1, btn), lambda i, j, k: (0, j)),
    ]
    args = [x2, w, b.reshape(1, N)]
    if residual is not None:
        in_specs.append(pl.BlockSpec((btm, btn), lambda i, j, k: (i, j)))
        args.append(residual.reshape(-1, N))

    out = pl.pallas_call(
        functools.partial(_linear_kernel, activation=activation,
                          has_residual=residual is not None),
        grid=(pl.cdiv(M, btm), N // btn, K // btk),
        in_specs=in_specs,
        out_specs=pl.BlockSpec((btm, btn), lambda i, j, k: (i, j)),
        out_shape=jax.ShapeDtypeStruct((M, N), x.dtype),
        scratch_shapes=[pltpu.VMEM((btm, btn), jnp.float32)],
        compiler_params=pltpu.CompilerParams(
            dimension_semantics=("parallel", "parallel", "arbitrary"),
            vmem_limit_bytes=_vmem_limit_bytes()),
    )(*args)
    return out.reshape(*lead, N)


def _ln_linear_kernel(x_ref, g_ref, bln_ref, w_ref, b_ref, o_ref, h_ref,
                      *, eps, activation):
    # LayerNorm of the row block is computed once (j == 0), cached in VMEM
    # scratch, and reused for every output-column tile of the same row block.
    @pl.when(pl.program_id(1) == 0)
    def _():
        x = x_ref[...].astype(jnp.float32)
        mean = jnp.mean(x, axis=-1, keepdims=True)
        var = jnp.mean(jnp.square(x - mean), axis=-1, keepdims=True)
        h = (x - mean) * jax.lax.rsqrt(var + eps) * g_ref[...].astype(jnp.float32) \
            + bln_ref[...].astype(jnp.float32)
        h_ref[...] = h.astype(h_ref.dtype)

    y = jnp.dot(h_ref[...], w_ref[...],
                preferred_element_type=jnp.float32) + b_ref[...].astype(jnp.float32)
    if activation == "gelu":
        y = jax.nn.gelu(y, approximate=False)
    elif activation == "tanh":
        y = jnp.tanh(y)
    o_ref[...] = y.astype(o_ref.dtype)


def ln_linear(x, gamma, beta, w, b, activation="none", eps=1e-12):
    """Fused LayerNorm(x) @ w + b with optional activation; LN result cached
    in VMEM across output-column tiles."""
    lead = x.shape[:-1]
    K = x.shape[-1]
    N = w.shape[1]
    x2 = x.reshape(-1, K)
    M = x2.shape[0]
    tm_t, tn_t, _ = _mm_tile_targets()
    btm = _row_tile(M, tm_t)
    btn = _col_tile(N, tn_t)
    out = pl.pallas_call(
        functools.partial(_ln_linear_kernel, eps=eps, activation=activation),
        grid=(pl.cdiv(M, btm), N // btn),
        in_specs=[
            pl.BlockSpec((btm, K), lambda i, j: (i, 0)),
            pl.BlockSpec((1, K), lambda i, j: (0, 0)),
            pl.BlockSpec((1, K), lambda i, j: (0, 0)),
            pl.BlockSpec((K, btn), lambda i, j: (0, j)),
            pl.BlockSpec((1, btn), lambda i, j: (0, j)),
        ],
        out_specs=pl.BlockSpec((btm, btn), lambda i, j: (i, j)),
        out_shape=jax.ShapeDtypeStruct((M, N), x.dtype),
        scratch_shapes=[pltpu.VMEM((btm, K), w.dtype)],
        compiler_params=pltpu.CompilerParams(
            # j must stay sequential so the pl.when(j == 0) LN cache is valid
            # for every subsequent column tile of the same row block.
            dimension_semantics=("parallel", "arbitrary"),
            vmem_limit_bytes=_vmem_limit_bytes()),
    )(x2, gamma.reshape(1, K), beta.reshape(1, K), w, b.reshape(1, N))
    return out.reshape(*lead, N)


def _attention_kernel(mask_ref, qkv_ref, o_ref, *maybe_p_ref, num_heads, scale):
    """One batch element per grid step.  qkv block is packed (1, Sp, 3H); heads
    are sliced in-kernel with static lane offsets.  Each head's context is
    stored directly into its lane slice of the output block."""
    H = o_ref.shape[-1]
    d = H // num_heads
    mask = mask_ref[0].astype(jnp.float32)          # (1, Sp) additive bias

    for h in range(num_heads):
        lo = h * d
        q = qkv_ref[0, :, lo:lo + d] * scale        # pre-scaled q, (Sp, d)
        k = qkv_ref[0, :, H + lo:H + lo + d]
        v = qkv_ref[0, :, 2 * H + lo:2 * H + lo + d]
        # Contract the feature axis of both operands directly (no explicit .T).
        s = jax.lax.dot_general(q, k, (((1,), (1,)), ((), ())),
                                preferred_element_type=jnp.float32) + mask
        s = s - jnp.max(s, axis=-1, keepdims=True)
        p = jnp.exp(s)
        p = p * pl.reciprocal(jnp.sum(p, axis=-1, keepdims=True), approx=False)
        if maybe_p_ref:
            p_ref = maybe_p_ref[0]
            p_ref[0, h] = p.astype(p_ref.dtype)     # f32 attention probabilities
        ctx = jax.lax.dot_general(p.astype(v.dtype), v, (((1,), (0,)), ((), ())),
                                  preferred_element_type=jnp.float32)
        o_ref[0, :, lo:lo + d] = ctx.astype(o_ref.dtype)


def multi_head_attention(qkv, additive_mask, hidden_size, num_heads,
                         output_attentions=False):
    """qkv: (B, Sp, 3H) packed (q | k | v).  additive_mask: (B, 1, Sp)."""
    B, Sp, threeH = qkv.shape
    H = hidden_size
    d = H // num_heads
    scale = 1.0 / math.sqrt(d)

    in_specs = [
        pl.BlockSpec((1, 1, Sp), lambda b: (b, 0, 0)),
        pl.BlockSpec((1, Sp, threeH), lambda b: (b, 0, 0)),
    ]
    cparams = pltpu.CompilerParams(
        dimension_semantics=("parallel",),
        vmem_limit_bytes=_vmem_limit_bytes())
    kernel = functools.partial(_attention_kernel, num_heads=num_heads, scale=scale)

    if output_attentions:
        ctx, probs = pl.pallas_call(
            kernel,
            grid=(B,),
            in_specs=in_specs,
            out_specs=(
                pl.BlockSpec((1, Sp, H), lambda b: (b, 0, 0)),
                pl.BlockSpec((1, num_heads, Sp, Sp), lambda b: (b, 0, 0, 0)),
            ),
            out_shape=(
                jax.ShapeDtypeStruct((B, Sp, H), qkv.dtype),
                jax.ShapeDtypeStruct((B, num_heads, Sp, Sp), jnp.float32),
            ),
            compiler_params=cparams,
        )(additive_mask, qkv)
        return ctx, probs

    ctx = pl.pallas_call(
        kernel,
        grid=(B,),
        in_specs=in_specs,
        out_specs=pl.BlockSpec((1, Sp, H), lambda b: (b, 0, 0)),
        out_shape=jax.ShapeDtypeStruct((B, Sp, H), qkv.dtype),
        compiler_params=cparams,
    )(additive_mask, qkv)
    return ctx, None


# ------------------------- model (glue in plain JAX) ------------------------ #

def encoder_layer(x, p, additive_mask, num_heads, output_attentions):
    H = x.shape[-1]

    # Fused LN1 + packed QKV projection (x read from HBM once; q/k/v never
    # materialized as separate HBM arrays).
    qkv = ln_linear(x, p["ln1_g"], p["ln1_b"], p["wqkv"], p["bqkv"])
    ctx, probs = multi_head_attention(qkv, additive_mask, H, num_heads,
                                      output_attentions)

    # Output projection with the residual add fused into the matmul epilogue.
    x = linear(ctx, p["wo"], p["bo"], residual=x)

    # Fused LN2 + W1 + exact GELU, then W2 with fused residual.
    inter = ln_linear(x, p["ln2_g"], p["ln2_b"], p["w1"], p["b1"],
                      activation="gelu")
    x = linear(inter, p["w2"], p["b2"], residual=x)
    return x, probs


def flava_transformer_without_embeddings_forward(hidden_states, params,
                                                 attention_mask=None,
                                                 num_heads=4,
                                                 output_attentions=False):
    """Mirrors FLAVATransformerWithoutEmbeddings.forward.

    Returns dict with last_hidden_state, pooler_output, hidden_states (tuple),
    attentions (tuple or None), image_labels (None)."""
    B, S, H = hidden_states.shape

    # cls token prepend (nn.Parameter initialized to zeros, as in the module).
    cls = jnp.broadcast_to(params["cls_token"].astype(hidden_states.dtype),
                           (B, 1, H))
    x = jnp.concatenate([cls, hidden_states], axis=1)
    S1 = S + 1

    # Pad the sequence ONCE to a sublane-aligned length; padding is folded into
    # the additive attention mask and trimmed from every returned tensor.
    seq_align = 16 if x.dtype == jnp.bfloat16 else 8
    Sp = _round_up(S1, seq_align)
    if Sp != S1:
        x = jnp.pad(x, ((0, 0), (0, Sp - S1), (0, 0)))

    valid = (jnp.arange(Sp) < S1).astype(jnp.float32)[None, :]        # (1, Sp)
    if attention_mask is not None:
        # attention_mask: (B, S1), 1 = attend, 0 = masked (HF-style keep mask)
        am = jnp.pad(attention_mask.astype(jnp.float32),
                     ((0, 0), (0, Sp - S1)))
        valid = valid * am                                            # (B, Sp)
    additive_mask = jnp.broadcast_to(
        ((1.0 - valid) * -1e4)[:, None, :], (B, 1, Sp)).astype(x.dtype)

    all_hidden = (x[:, :S1],)
    all_attn = ()
    for layer_params in params["layers"]:
        x, probs = encoder_layer(x, layer_params, additive_mask, num_heads,
                                 output_attentions)
        all_hidden = all_hidden + (x[:, :S1],)
        if output_attentions:
            all_attn = all_attn + (probs[:, :, :S1, :S1],)

    # module-level final layernorm
    seq_out = layernorm(x, params["final_ln_g"], params["final_ln_b"])[:, :S1]

    # pooler: first token -> Linear -> tanh
    pooled = linear(seq_out[:, 0, :], params["pool_w"], params["pool_b"],
                    activation="tanh")

    return {
        "last_hidden_state": seq_out,
        "pooler_output": pooled,
        "hidden_states": all_hidden,
        "attentions": all_attn if output_attentions else None,
        "image_labels": None,
    }


# ------------------------------- init helpers ------------------------------ #

def init_params(key, hidden_size, intermediate_size, num_layers,
                initializer_range=0.02, dtype=jnp.float32):
    def normal(key, shape):
        return jax.random.normal(key, shape, dtype=dtype) * initializer_range

    layers = []
    for i in range(num_layers):
        ks = jax.random.split(jax.random.fold_in(key, i), 6)
        wq = normal(ks[0], (hidden_size, hidden_size))
        wk = normal(ks[1], (hidden_size, hidden_size))
        wv = normal(ks[2], (hidden_size, hidden_size))
        layers.append({
            "ln1_g": jnp.ones((hidden_size,), dtype),
            "ln1_b": jnp.zeros((hidden_size,), dtype),
            # concatenated QKV weight so LN1 + all three projections fuse
            "wqkv": jnp.concatenate([wq, wk, wv], axis=1),
            "bqkv": jnp.zeros((3 * hidden_size,), dtype),
            "wo": normal(ks[3], (hidden_size, hidden_size)),
            "bo": jnp.zeros((hidden_size,), dtype),
            "ln2_g": jnp.ones((hidden_size,), dtype),
            "ln2_b": jnp.zeros((hidden_size,), dtype),
            "w1": normal(ks[4], (hidden_size, intermediate_size)),
            "b1": jnp.zeros((intermediate_size,), dtype),
            "w2": normal(ks[5], (intermediate_size, hidden_size)),
            "b2": jnp.zeros((hidden_size,), dtype),
        })

    kp = jax.random.fold_in(key, 1000)
    return {
        "cls_token": jnp.zeros((1, 1, hidden_size), dtype),  # nn.Parameter(zeros)
        "layers": layers,
        "final_ln_g": jnp.ones((hidden_size,), dtype),
        "final_ln_b": jnp.zeros((hidden_size,), dtype),
        "pool_w": jax.random.normal(kp, (hidden_size, hidden_size), dtype) * 0.02,
        "pool_b": jnp.zeros((hidden_size,), dtype),
    }


# ---------------------------------- main ----------------------------------- #

if __name__ == "__main__":
    B, S, H = 2, 8, 32
    NUM_HEADS = 4
    INTERMEDIATE = 64
    NUM_LAYERS = 2

    key = jax.random.PRNGKey(0)
    k_in, k_par = jax.random.split(key)

    hidden_states = jax.random.normal(k_in, (B, S, H), dtype=jnp.float32)
    params = init_params(k_par, H, INTERMEDIATE, NUM_LAYERS)

    # Fast path (default): no attention-probability writeback.
    out = flava_transformer_without_embeddings_forward(
        hidden_states, params, attention_mask=None, num_heads=NUM_HEADS)
    jax.block_until_ready(out["last_hidden_state"])
    jax.block_until_ready(out["pooler_output"])
    assert out["last_hidden_state"].shape == (B, S + 1, H)
    assert out["pooler_output"].shape == (B, H)
    assert len(out["hidden_states"]) == NUM_LAYERS + 1
    assert out["attentions"] is None
    assert bool(jnp.all(jnp.isfinite(out["last_hidden_state"])))

    # Path that also returns attention probabilities (and exercises the mask).
    out_attn = flava_transformer_without_embeddings_forward(
        hidden_states, params,
        attention_mask=jnp.ones((B, S + 1), dtype=jnp.float32),
        num_heads=NUM_HEADS, output_attentions=True)
    jax.block_until_ready(out_attn["last_hidden_state"])
    assert len(out_attn["attentions"]) == NUM_LAYERS
    assert out_attn["attentions"][0].shape == (B, NUM_HEADS, S + 1, S + 1)
    assert bool(jnp.all(jnp.isfinite(out_attn["attentions"][0])))

    print("KERNEL_OK")
</pallas_src>

<mosaic_0001>
module attributes {stable_mosaic.version = 11 : i64} {
  func.func @_ln_linear_kernel(%arg0: i32, %arg1: i32, %arg2: memref<32x32xf32, #tpu.memory_space<vmem>>, %arg3: memref<1x32xf32, #tpu.memory_space<vmem>>, %arg4: memref<1x32xf32, #tpu.memory_space<vmem>>, %arg5: memref<32x96xf32, #tpu.memory_space<vmem>>, %arg6: memref<1x96xf32, #tpu.memory_space<vmem>>, %arg7: memref<32x96xf32, #tpu.memory_space<vmem>>, %arg8: memref<32x32xf32, #tpu.memory_space<vmem>>) attributes {dimension_semantics = [#tpu.dimension_semantics<parallel>, #tpu.dimension_semantics<arbitrary>], iteration_bounds = array<i64: 1, 1>, scalar_prefetch = 0 : i64, scratch_operands = 1 : i64, tpu.core_type = #tpu.core_type<tc>, window_params = [{transform_indices = @transform_0, window_bounds = array<i64: 32, 32>}, {pipeline_mode = #tpu.pipeline_mode<synchronous>, transform_indices = @transform_1, window_bounds = array<i64: 1, 32>}, {pipeline_mode = #tpu.pipeline_mode<synchronous>, transform_indices = @transform_2, window_bounds = array<i64: 1, 32>}, {transform_indices = @transform_3, window_bounds = array<i64: 32, 96>}, {transform_indices = @transform_4, window_bounds = array<i64: 1, 96>}, {transform_indices = @transform_5, window_bounds = array<i64: 32, 96>}]} {
    %c0_i32 = arith.constant 0 : i32
    %0 = arith.cmpi eq, %arg1, %c0_i32 : i32
    %1 = arith.extui %0 : i1 to i32
    %c0_i32_0 = arith.constant 0 : i32
    %2 = arith.cmpi ne, %1, %c0_i32_0 : i32
    scf.if %2 {
      %c0_8 = arith.constant 0 : index
      %c0_9 = arith.constant 0 : index
      %10 = vector.load %arg2[%c0_8, %c0_9] : memref<32x32xf32, #tpu.memory_space<vmem>>, vector<32x32xf32>
      %cst_10 = arith.constant dense<0.000000e+00> : vector<32xf32>
      %11 = vector.multi_reduction <add>, %10, %cst_10 [1] : vector<32x32xf32> to vector<32xf32>
      %12 = vector.shape_cast %11 : vector<32xf32> to vector<32x1xf32>
      %cst_11 = arith.constant 3.200000e+01 : f32
      %13 = vector.broadcast %cst_11 : f32 to vector<32x1xf32>
      %14 = arith.divf %12, %13 : vector<32x1xf32>
      %15 = vector.broadcast %14 : vector<32x1xf32> to vector<32x32xf32>
      %16 = arith.subf %10, %15 : vector<32x32xf32>
      %17 = arith.mulf %16, %16 : vector<32x32xf32>
      %cst_12 = arith.constant dense<0.000000e+00> : vector<32xf32>
      %18 = vector.multi_reduction <add>, %17, %cst_12 [1] : vector<32x32xf32> to vector<32xf32>
      %19 = vector.shape_cast %18 : vector<32xf32> to vector<32x1xf32>
      %cst_13 = arith.constant 3.200000e+01 : f32
      %20 = vector.broadcast %cst_13 : f32 to vector<32x1xf32>
      %21 = arith.divf %19, %20 : vector<32x1xf32>
      %22 = vector.broadcast %14 : vector<32x1xf32> to vector<32x32xf32>
      %23 = arith.subf %10, %22 : vector<32x32xf32>
      %cst_14 = arith.constant 9.99999996E-13 : f32
      %24 = vector.broadcast %cst_14 : f32 to vector<32x1xf32>
      %25 = arith.addf %21, %24 : vector<32x1xf32>
      %26 = math.rsqrt %25 : vector<32x1xf32>
      %27 = vector.broadcast %26 : vector<32x1xf32> to vector<32x32xf32>
      %28 = arith.mulf %23, %27 : vector<32x32xf32>
      %c0_15 = arith.constant 0 : index
      %c0_16 = arith.constant 0 : index
      %29 = vector.load %arg3[%c0_15, %c0_16] : memref<1x32xf32, #tpu.memory_space<vmem>>, vector<1x32xf32>
      %30 = vector.broadcast %29 : vector<1x32xf32> to vector<32x32xf32>
      %31 = arith.mulf %28, %30 : vector<32x32xf32>
      %c0_17 = arith.constant 0 : index
      %c0_18 = arith.constant 0 : index
      %32 = vector.load %arg4[%c0_17, %c0_18] : memref<1x32xf32, #tpu.memory_space<vmem>>, vector<1x32xf32>
      %33 = vector.broadcast %32 : vector<1x32xf32> to vector<32x32xf32>
      %34 = arith.addf %31, %33 : vector<32x32xf32>
      %c0_19 = arith.constant 0 : index
      %c0_20 = arith.constant 0 : index
      %35 = vector.load %arg8[%c0_19, %c0_20] : memref<32x32xf32, #tpu.memory_space<vmem>>, vector<32x32xf32>
      tpu.vector_store %arg8[%c0_19, %c0_20], %34 {strides = array<i32>} : memref<32x32xf32, #tpu.memory_space<vmem>>, vector<32x32xf32>,
    } else {
    }
    %c0 = arith.constant 0 : index
    %c0_1 = arith.constant 0 : index
    %3 = vector.load %arg8[%c0, %c0_1] : memref<32x32xf32, #tpu.memory_space<vmem>>, vector<32x32xf32>
    %c0_2 = arith.constant 0 : index
    %c0_3 = arith.constant 0 : index
    %4 = vector.load %arg5[%c0_2, %c0_3] : memref<32x96xf32, #tpu.memory_space<vmem>>, vector<32x96xf32>
    %cst = arith.constant dense<0.000000e+00> : vector<32x96xf32>
    %5 = tpu.matmul %3, %4, %cst {dimension_numbers = #tpu.dot_dimension_numbers<[1], [0], [0], [1], [0, 0, 1, 1], [], []>} : vector<32x32xf32>, vector<32x96xf32>, vector<32x96xf32> -> vector<32x96xf32>
    %c0_4 = arith.constant 0 : index
    %c0_5 = arith.constant 0 : index
    %6 = vector.load %arg6[%c0_4, %c0_5] : memref<1x96xf32, #tpu.memory_space<vmem>>, vector<1x96xf32>
    %7 = vector.broadcast %6 : vector<1x96xf32> to vector<32x96xf32>
    %8 = arith.addf %5, %7 : vector<32x96xf32>
    %c0_6 = arith.constant 0 : index
    %c0_7 = arith.constant 0 : index
    %9 = vector.load %arg7[%c0_6, %c0_7] : memref<32x96xf32, #tpu.memory_space<vmem>>, vector<32x96xf32>
    tpu.vector_store %arg7[%c0_6, %c0_7], %8 {strides = array<i32>} : memref<32x96xf32, #tpu.memory_space<vmem>>, vector<32x96xf32>,
    return
  }
  func.func @transform_0(%arg0: i32, %arg1: i32) -> (i32, i32) {
    %c0_i32 = arith.constant 0 : i32
    %c0_i32_0 = arith.constant 0 : i32
    return %arg0, %c0_i32 : i32, i32
  }
  func.func @transform_1(%arg0: i32, %arg1: i32) -> (i32, i32) {
    %c0_i32 = arith.constant 0 : i32
    %c0_i32_0 = arith.constant 0 : i32
    %c0_i32_1 = arith.constant 0 : i32
    return %c0_i32, %c0_i32_0 : i32, i32
  }
  func.func @transform_2(%arg0: i32, %arg1: i32) -> (i32, i32) {
    %c0_i32 = arith.constant 0 : i32
    %c0_i32_0 = arith.constant 0 : i32
    %c0_i32_1 = arith.constant 0 : i32
    return %c0_i32, %c0_i32_0 : i32, i32
  }
  func.func @transform_3(%arg0: i32, %arg1: i32) -> (i32, i32) {
    %c0_i32 = arith.constant 0 : i32
    %c0_i32_0 = arith.constant 0 : i32
    return %c0_i32, %arg1 : i32, i32
  }
  func.func @transform_4(%arg0: i32, %arg1: i32) -> (i32, i32) {
    %c0_i32 = arith.constant 0 : i32
    %c0_i32_0 = arith.constant 0 : i32
    return %c0_i32, %arg1 : i32, i32
  }
  func.func @transform_5(%arg0: i32, %arg1: i32) -> (i32, i32) {
    %c0_i32 = arith.constant 0 : i32
    return %arg0, %arg1 : i32, i32
  }
}

</mosaic_0001>

<bundles_post_ra>
// kernel: tpu_custom_call.1
= control target key start
LH: loop header
LB: loop body
LE: loop exit
PB: predicated region body
PF: predicated region fallthrough
CT: control target
= control target key end

     0   :  { %10 = vsyncpa [#allocation4], 0  ;;  %s504_s0 = inlined_call_operand.hbm [shape: f32[32,32], index: 0, kind: input, shape index: {}]   ;;  %s505_s1 = inlined_call_operand.vmem [shape: f32[1,32], index: 1, kind: input, shape index: {}]   ;;  %s506_s2 = inlined_call_operand.vmem [shape: f32[1,32], index: 2, kind: input, shape index: {}]   ;;  %s507_s3 = inlined_call_operand.hbm [shape: f32[32,96], index: 3, kind: input, shape index: {}]   ;;  %s508_s4 = inlined_call_operand.vmem [shape: f32[1,96], index: 4, kind: input, shape index: {}]   ;;  %s509_s5 = inlined_call_operand.hbm [shape: f32[32,96], index: 5, kind: output, shape index: {}]  }
   0x1   :  { %11 = vsyncpa [#allocation7], 0 }
   0x2   :  { %12 = vsyncpa [#allocation5], 0  ;;  %s399_s18 = smov [#allocation3]   ;;  %s327_s22 = scalar_lea.hbm %s504_s0, 512 }
   0x3   :  { %s18_s19 = sshll.u32 %s399_s18, 4  ;;  %p328_p0 = scmp.ne.s32.totalorder %s504_s0, %s327_s22  ;;  %s19_s19 = int_to_ptr.vmem [resolvable:$true] %s18_s19 }
   0x4   :  { %p331_p1 = scmp.lt.u32.totalorder %s327_s22, %s504_s0 }
   0x6   :  { %p333_p2 = pnand %p331_p1, %p328_p0 }
   0x8   :  { %336 = shalt.err (!%p333_p2)
}
   0x9   :  { %s337_s27 = scalar_lea.vmem %s19_s19, 512  ;;  %p342_p4 = scmp.lt.s32.totalorder %s19_s19, %s19_s19 }
   0xa   :  { %p338_p3 = scmp.ne.s32.totalorder %s19_s19, %s337_s27  ;;  %p343_p5 = scmp.lt.s32.totalorder %s337_s27, %s337_s27 }
   0xc   :  { %p344_p6 = por %p343_p5, %p342_p4 }
   0xe   :  { %p345_p7 = pnand %p344_p6, %p338_p3 }
  0x10   :  { %348 = shalt.err (!%p345_p7)
}
  0x11   :  { %s400_s28 = smov 128   ;;  %s401_s29 = smov 8  }
  0x12   :  { %24 = dma.hbm_to_vmem [thread:$0]  %s504_s0, 512, %s19_s19, [#allocation4], %s400_s28, %s400_s28, %s401_s29  }
  0x13   :  { %s402_s7 = smov [#allocation6]   ;;  %s349_s11 = scalar_lea.hbm %s507_s3, 512 }
  0x14   :  { %s34_s8 = sshll.u32 %s402_s7, 4  ;;  %p350_p8 = scmp.ne.s32.totalorder %s507_s3, %s349_s11  ;;  %s35_s8 = int_to_ptr.vmem [resolvable:$true] %s34_s8 }
  0x15   :  { %p353_p9 = scmp.lt.u32.totalorder %s349_s11, %s507_s3 }
  0x17   :  { %p355_p10 = pnand %p353_p9, %p350_p8 }
  0x19   :  { %358 = shalt.err (!%p355_p10)
}
  0x1a   :  { %s359_s16 = scalar_lea.vmem %s35_s8, 512  ;;  %p364_p12 = scmp.lt.s32.totalorder %s35_s8, %s35_s8 }
  0x1b   :  { %p360_p11 = scmp.ne.s32.totalorder %s35_s8, %s359_s16  ;;  %p365_p13 = scmp.lt.s32.totalorder %s359_s16, %s359_s16 }
  0x1d   :  { %p366_p0 = por %p365_p13, %p364_p12 }
  0x1f   :  { %p367_p1 = pnand %p366_p0, %p360_p11 }
  0x21   :  { %370 = shalt.err (!%p367_p1)
}
  0x22   :  { %40 = dma.hbm_to_vmem [thread:$0]  %s507_s3, 512, %s35_s8, [#allocation7], %s400_s28, %s400_s28, %s401_s29  }
  0x23   :  { %393 = dma.done.wait [#allocation4], 512  }
  0x24   :  { %394 = vsyncadd [#allocation4], 4294966784 }
  0x25   :  { %395 = dma.done.wait [#allocation7], 512  }
  0x26   :  { %396 = vsyncadd [#allocation7], 4294966784  ;;  %vm57_vm0 = vcmask 261120   ;;  %v53_v0 = vld [vmem:[#allocation3] sm:$0xff]  ;;  %v54_v1 = vld [vmem:[#allocation3 + $0x8] sm:$0xff]  ;;  %vm250_vm1 = vcmask 785408  }
  0x27   :  { %v55_v2 = vld [vmem:[#allocation3 + $0x10] sm:$0xff]  ;;  %v58_v3 = vsel %vm57_vm0, %v53_v0, 0.0  ;;  %v61_v4 = vsel %vm57_vm0, %v54_v1, 0.0  ;;  %v56_v5 = vld [vmem:[#allocation3 + $0x18] sm:$0xff]  ;;  %v141_v28 = vld [vmem:[#allocation6] sm:$0xff]  ;;  %s403_s21 = smov [#allocation8]  }
  0x28   :  { %59 = vadd.xlane.f32.xlu0 %v58_v3  ;;  %62 = vadd.xlane.f32.xlu1 %v61_v4  ;;  %v64_v6 = vsel %vm57_vm0, %v55_v2, 0.0  ;;  %v67_v7 = vsel %vm57_vm0, %v56_v5, 0.0  ;;  %v142_v29 = vld [vmem:[#allocation6 + $0x8] sm:$0xff]  ;;  %v143_v31 = vld [vmem:[#allocation6 + $0x10] sm:$0xff]  ;;  %v144_v32 = vld [vmem:[#allocation6 + $0x18] sm:$0xff]  ;;  %s260_s22 = sshll.u32 %s403_s21, 4  ;;  %s261_s22 = int_to_ptr.vmem [resolvable:$true] %s260_s22 }
  0x29   :  { %v302_v30 = vpack.c.bf16 %v142_v29, %v141_v28  ;;  %v306_v33 = vpack.c.bf16 %v144_v32, %v143_v31  ;;  %v273_v47 = vld [vmem:[%s505_s1] ss:$0 sm:$0xff]  ;;  %s371_s23 = scalar_lea.vmem %s261_s22, 512  ;;  %p376_p3 = scmp.lt.s32.totalorder %s261_s22, %s261_s22 }
  0x2a   :  { %v274_v49 = vld [vmem:[%s506_s2] ss:$0 sm:$0xff]  ;;  %p372_p2 = scmp.ne.s32.totalorder %s261_s22, %s371_s23  ;;  %p377_p4 = scmp.lt.s32.totalorder %s371_s23, %s371_s23 }
  0x2b   :  { %303 = vmatprep.subr.bf16.mxu0 %v302_v30  ;;  %310 = vmatprep.subr.bf16.mxu1 %v302_v30  ;;  %v275_v4 = vld [vmem:[%s508_s4] ss:$0 sm:$0xff] }
  0x2c   :  { %65 = vadd.xlane.f32.xlu0 %v64_v6  ;;  %68 = vadd.xlane.f32.xlu1 %v67_v7  ;;  %p378_p5 = por %p377_p4, %p376_p3 }
  0x2d   :  { %305 = vmatpush3.bf16.msra.mxu0 %v302_v30  ;;  %312 = vmatpush3.bf16.msra.mxu1 %v302_v30 }
  0x2e   :  { %307 = vmatprep.subr.bf16.mxu0 %v306_v33  ;;  %311 = vmatprep.subr.bf16.mxu1 %v306_v33  ;;  %p379_p6 = pnand %p378_p5, %p372_p2 }
  0x31   :  { %309 = vmatpush3.bf16.msra.mxu0 %v306_v33  ;;  %313 = vmatpush3.bf16.msra.mxu1 %v306_v33 }
  0xb5   :  { %v60_v8 = vpop.xlane.xlu0 %59  ;;  %v63_v9 = vpop.xlane.xlu1 %62 }
  0xb6   :  { %v71_v10 = vmul.f32 0.03125, %v60_v8  ;;  %v72_v11 = vmul.f32 0.03125, %v63_v9 }
  0xb8   :  { %v75_v12 = vsub.f32 %v53_v0, %v71_v10  ;;  %v76_v13 = vsub.f32 %v54_v1, %v72_v11 }
  0xb9   :  { %v66_v14 = vpop.xlane.xlu0 %65  ;;  %v69_v15 = vpop.xlane.xlu1 %68 }
  0xba   :  { %v73_v16 = vmul.f32 0.03125, %v66_v14  ;;  %v74_v17 = vmul.f32 0.03125, %v69_v15  ;;  %v79_v18 = vmul.f32 %v75_v12, %v75_v12  ;;  %v80_v19 = vmul.f32 %v76_v13, %v76_v13 }
  0xbc   :  { %v77_v20 = vsub.f32 %v55_v2, %v73_v16  ;;  %v78_v21 = vsub.f32 %v56_v5, %v74_v17  ;;  %v83_v22 = vsel %vm57_vm0, %v79_v18, 0.0  ;;  %v86_v23 = vsel %vm57_vm0, %v80_v19, 0.0 }
  0xbd   :  { %84 = vadd.xlane.f32.xlu0 %v83_v22 }
  0xbe   :  { %v81_v24 = vmul.f32 %v77_v20, %v77_v20  ;;  %v82_v25 = vmul.f32 %v78_v21, %v78_v21 }
  0xc0   :  { %v89_v26 = vsel %vm57_vm0, %v81_v24, 0.0  ;;  %v92_v27 = vsel %vm57_vm0, %v82_v25, 0.0 }
  0xc1   :  { %87 = vadd.xlane.f32.xlu0 %v86_v23  ;;  %90 = vadd.xlane.f32.xlu1 %v89_v26 }
  0xc5   :  { %93 = vadd.xlane.f32.xlu1 %v92_v27 }
 0x14a   :  { %v85_v34 = vpop.xlane.xlu0 %84 }
 0x14b   :  { %v95_v35 = vmul.f32 0.03125, %v85_v34 }
 0x14d   :  { %v99_v36 = vadd.f32 1e-12, %v95_v35 }
 0x14e   :  { %v91_v37 = vpop.xlane.xlu1 %90  ;;  %v88_v38 = vpop.xlane.xlu0 %87 }
 0x14f   :  { %319 = vrsqrt.f32 %v99_v36  ;;  %v97_v39 = vmul.f32 0.03125, %v91_v37  ;;  %v96_v40 = vmul.f32 0.03125, %v88_v38 }
 0x151   :  { %v101_v41 = vadd.f32 1e-12, %v97_v39  ;;  %v100_v42 = vadd.f32 1e-12, %v96_v40 }
 0x152   :  { %v94_v43 = vpop.xlane.xlu1 %93 }
 0x153   :  { %321 = vrsqrt.f32 %v101_v41  ;;  %v98_v44 = vmul.f32 0.03125, %v94_v43 }
 0x154   :  { %323 = vrsqrt.f32 %v100_v42 }
 0x155   :  { %v102_v45 = vadd.f32 1e-12, %v98_v44 }
 0x157   :  { %325 = vrsqrt.f32 %v102_v45 }
 0x159   :  { %v320_v46 = vpop.eup %319 }
 0x15a   :  { %v107_v48 = vmul.f32 %v320_v46, %v75_v12 }
 0x15c   :  { %v118_v50 = vmul.f32 %v273_v47, %v107_v48 }
 0x15d   :  { %v322_v51 = vpop.eup %321 }
 0x15e   :  { %v324_v52 = vpop.eup %323  ;;  %v129_v53 = vadd.f32 %v274_v49, %v118_v50  ;;  %v109_v54 = vmul.f32 %v322_v51, %v77_v20 }
 0x15f   :  { %v108_v55 = vmul.f32 %v324_v52, %v76_v13 }
 0x160   :  { %133 = vst.msk [vmem:[#allocation2] sm:$0xff] %vm57_vm0, %v129_v53  ;;  %v120_v56 = vmul.f32 %v273_v47, %v109_v54 }
 0x161   :  { %v326_v57 = vpop.eup %325  ;;  %v119_v58 = vmul.f32 %v273_v47, %v108_v55 }
 0x162   :  { %v131_v59 = vadd.f32 %v274_v49, %v120_v56  ;;  %v110_v60 = vmul.f32 %v326_v57, %v78_v21 }
 0x163   :  { %v130_v61 = vadd.f32 %v274_v49, %v119_v58 }
 0x164   :  { %135 = vst.msk [vmem:[#allocation2 + $0x10] sm:$0xff] %vm57_vm0, %v131_v59  ;;  %v121_v62 = vmul.f32 %v273_v47, %v110_v60 }
 0x165   :  { %134 = vst.msk [vmem:[#allocation2 + $0x8] sm:$0xff] %vm57_vm0, %v130_v61 }
 0x166   :  { %v132_v63 = vadd.f32 %v274_v49, %v121_v62 }
 0x167   :  { %v137_v0 = vld [vmem:[#allocation2] sm:$0xff] }
 0x168   :  { %136 = vst.msk [vmem:[#allocation2 + $0x18] sm:$0xff] %vm57_vm0, %v132_v63  ;;  %296 = vmatprep.mubr.msk.f32.mxu0 %vm57_vm0, %v137_v0 }
 0x16b   :  { %v139_v1 = vld [vmem:[#allocation2 + $0x10] sm:$0xff] }
 0x16c   :  { %v138_v2 = vld [vmem:[#allocation2 + $0x8] sm:$0xff]  ;;  %299 = vmatprep.mubr.msk.f32.mxu1 %vm57_vm0, %v139_v1 }
 0x16d   :  { %297 = vmatmul.mubr.msk.f32.vlgmr.msra.gmra.mrb[0].mxu0 %vm57_vm0, %v138_v2 }
 0x16f   :  { %v140_v3 = vld [vmem:[#allocation2 + $0x18] sm:$0xff] }
 0x170   :  { %300 = vmatmul.mubr.msk.f32.vlgmr.msra.gmra.mrb[0].mxu1 %vm57_vm0, %v140_v3 }
 0x240   :  { %v298_v5 = vpop.f32.mrb[0].mxu0 }
 0x241   :  { %v237_v6 = vadd.f32 %v298_v5, %v275_v4  ;;  %v231_v7 = vpop.f32.mrb[1].mxu0 }
 0x242   :  { %v232_v8 = vadd.f32 %v275_v4, %v231_v7 }
 0x243   :  { %252 = vst.msk [vmem:[#allocation8 + $0x8] sm:$0xff] %vm250_vm1, %v237_v6  ;;  %v301_v9 = vpop.f32.mrb[0].mxu1 }
 0x244   :  { %251 = vst.msk [vmem:[#allocation8] sm:$0xff] %vm250_vm1, %v232_v8  ;;  %v247_v10 = vadd.f32 %v301_v9, %v275_v4  ;;  %v241_v11 = vpop.f32.mrb[1].mxu1 }
 0x245   :  { %v242_v12 = vadd.f32 %v275_v4, %v241_v11 }
 0x246   :  { %254 = vst.msk [vmem:[#allocation8 + $0x18] sm:$0xff] %vm250_vm1, %v247_v10 }
 0x247   :  { %253 = vst.msk [vmem:[#allocation8 + $0x10] sm:$0xff] %vm250_vm1, %v242_v12 }
 0x248   :  { %382 = shalt.err (!%p379_p6)
}
 0x249   :  { %s383_s25 = scalar_lea.hbm %s509_s5, 512 }
 0x24a   :  { %p384_p7 = scmp.ne.s32.totalorder %s509_s5, %s383_s25  ;;  %p387_p8 = scmp.lt.u32.totalorder %s383_s25, %s509_s5 }
 0x24c   :  { %p389_p9 = pnand %p387_p8, %p384_p7 }
 0x24e   :  { %392 = shalt.err (!%p389_p9)
}
 0x24f   :  { %266 = dma.vmem_to_hbm [thread:$0]  %s261_s22, 512, %s509_s5, [#allocation5], %s400_s28, %s400_s28, %s401_s29  }
 0x250   :  { %397 = dma.done.wait [#allocation5], 512  }
 0x251   :  { %398 = vsyncadd [#allocation5], 4294966784 }
 0x252   :  { %270 = vsyncpa [#allocation4], 1 }
 0x253   :  { %271 = vsyncpa [#allocation7], 1 }
 0x254   :  { %272 = vsyncpa [#allocation5], 1 }

</bundles_post_ra>
